<compile_context>
chip_gen: v7x
topology: tpu7x:2x2x1
jax: 0.10.0
libtpu: 0.0.40
codegen_flags: <defaults>
</compile_context>

<pallas_src>
import functools

import jax
import jax.numpy as jnp
from jax import lax
from jax.experimental import pallas as pl
from jax.experimental.pallas import tpu as pltpu

_LANES = 128          # lane width of a vreg
_CHUNK = 8            # sublane rows per inner-loop step (1 vreg per feature slice)

# offsets of the packed parameters inside the (128,) f32 SMEM vector
_W1_OFF = 0           # w1 (8, 6) row-major -> 48 scalars
_B1_OFF = 48          # b1 (6,)
_W2_OFF = 54          # w2 (6, 4) row-major -> 24 scalars
_B2_OFF = 78          # b2 (4,)
_W3_OFF = 82          # w3 (4,)
_B3_OFF = 86          # b3 (1,)
_PACKED_LEN = 128


def _sigmoid(v):
    # exp on the EUP; exact reciprocal so the result matches the f32 reference.
    return pl.reciprocal(1.0 + jnp.exp(-v), approx=False)


def _mlp_kernel(p_ref, x_ref, o_ref):
    """p_ref: (128,) f32 packed params in SMEM.
       x_ref: (8, TS, 128) f32 VMEM tile (feature, batch-sublane, batch-lane).
       o_ref: (TS, 128) f32 VMEM tile."""
    ts = o_ref.shape[0]
    n_chunks = ts // _CHUNK

    # Hoist all 87 scalar reads out of the chunk loop (SMEM -> scalars, once per tile).
    w1 = [[p_ref[_W1_OFF + i * 6 + j] for j in range(6)] for i in range(8)]
    b1 = [p_ref[_B1_OFF + j] for j in range(6)]
    w2 = [[p_ref[_W2_OFF + i * 4 + j] for j in range(4)] for i in range(6)]
    b2 = [p_ref[_B2_OFF + j] for j in range(4)]
    w3 = [p_ref[_W3_OFF + i] for i in range(4)]
    b3 = p_ref[_B3_OFF]

    def body(c, carry):
        r0 = pl.multiple_of(c * _CHUNK, _CHUNK)
        rows = pl.ds(r0, _CHUNK)
        xs = [x_ref[i, rows, :] for i in range(8)]          # 8 dense (_CHUNK, 128) tiles

        # layer 1: 8 -> 6 (pure VPU broadcast-FMA)
        h1 = []
        for j in range(6):
            acc = xs[0] * w1[0][j]
            for i in range(1, 8):
                acc = acc + xs[i] * w1[i][j]
            h1.append(_sigmoid(acc + b1[j]))

        # layer 2: 6 -> 4
        h2 = []
        for j in range(4):
            acc = h1[0] * w2[0][j]
            for i in range(1, 6):
                acc = acc + h1[i] * w2[i][j]
            h2.append(_sigmoid(acc + b2[j]))

        # layer 3: 4 -> 1
        acc = h2[0] * w3[0]
        for i in range(1, 4):
            acc = acc + h2[i] * w3[i]
        o_ref[rows, :] = _sigmoid(acc + b3)
        return carry

    lax.fori_loop(0, n_chunks, body, 0, unroll=min(2, n_chunks))


def _pack_params(params):
    flat = jnp.concatenate([
        params["w1"].reshape(-1), params["b1"].reshape(-1),
        params["w2"].reshape(-1), params["b2"].reshape(-1),
        params["w3"].reshape(-1), params["b3"].reshape(-1),
    ]).astype(jnp.float32)
    return jnp.pad(flat, (0, _PACKED_LEN - flat.shape[0]))


@functools.partial(jax.jit, static_argnames=("block_rows",))
def sigmoid_mlp(x, params, *, block_rows=1024):
    """x: (B, 8); params: w1 (8,6), b1 (1,6), w2 (6,4), b2 (1,4), w3 (4,1), b3 (1,1).
    Returns (B, 1) float32 = sigmoid(L3(sigmoid(L2(sigmoid(L1(x))))))."""
    B, F = x.shape
    assert F == 8, f"expected 8 input features, got {F}"
    block_rows = max(8, (block_rows // 8) * 8)

    packed = _pack_params(params)

    # Map batch onto a dense (rows, 128) grid; pad B up to a whole number of tiles.
    rows_needed = pl.cdiv(B, _LANES)
    ts = max(_CHUNK, min(block_rows, ((rows_needed + 7) // 8) * 8))
    n_tiles = pl.cdiv(rows_needed, ts)
    rows = n_tiles * ts
    b_pad = rows * _LANES

    # NOTE: reading x as bf16 would halve HBM traffic on v6e/v7x if the caller allows it.
    xp = jnp.pad(x.astype(jnp.float32), ((0, b_pad - B), (0, 0)))
    xt = xp.T.reshape(8, rows, _LANES)          # feature-major, batch dense on (sublane, lane)

    out = pl.pallas_call(
        _mlp_kernel,
        out_shape=jax.ShapeDtypeStruct((rows, _LANES), jnp.float32),
        grid_spec=pltpu.PrefetchScalarGridSpec(
            num_scalar_prefetch=0,
            grid=(n_tiles,),
            in_specs=[
                pl.BlockSpec(memory_space=pltpu.MemorySpace.SMEM),    # packed params, resident
                pl.BlockSpec((8, ts, _LANES), lambda t: (0, t, 0)),   # x batch tile
            ],
            out_specs=pl.BlockSpec((ts, _LANES), lambda t: (t, 0)),
        ),
        compiler_params=pltpu.CompilerParams(
            dimension_semantics=("parallel",),     # shard batch tiles across TCs on v7x
            vmem_limit_bytes=32 * 1024 * 1024,
        ),
    )(packed, xt)

    return out.reshape(b_pad, 1)[:B]


def init_params(key):
    """torch.nn.Linear-style init U(-1/sqrt(fan_in), 1/sqrt(fan_in)); weights stored (in, out)."""
    dims = [(8, 6), (6, 4), (4, 1)]
    params = {}
    keys = jax.random.split(key, 2 * len(dims))
    for i, (fan_in, fan_out) in enumerate(dims):
        bound = 1.0 / float(fan_in) ** 0.5
        params[f"w{i + 1}"] = jax.random.uniform(
            keys[2 * i], (fan_in, fan_out), minval=-bound, maxval=bound, dtype=jnp.float32)
        params[f"b{i + 1}"] = jax.random.uniform(
            keys[2 * i + 1], (1, fan_out), minval=-bound, maxval=bound, dtype=jnp.float32)
    return params


def reference(x, params):
    sig = lambda v: 1.0 / (1.0 + jnp.exp(-v))
    h1 = sig(x @ params["w1"] + params["b1"])
    h2 = sig(h1 @ params["w2"] + params["b2"])
    return sig(h2 @ params["w3"] + params["b3"])


if __name__ == "__main__":
    key = jax.random.PRNGKey(0)
    k_x, k_x2, k_p = jax.random.split(key, 3)
    params = init_params(k_p)

    # Small case matching the module: batch=2, 8 input features.
    B = 2
    x = jax.random.normal(k_x, (B, 8), dtype=jnp.float32)
    y = sigmoid_mlp(x, params)
    jax.block_until_ready(y)
    assert y.shape == (B, 1)
    assert jnp.allclose(y, reference(x, params), atol=1e-5, rtol=1e-5)

    # Multi-tile case: exercises padding + the pipelined parallel grid.
    B2 = 2000
    x2 = jax.random.normal(k_x2, (B2, 8), dtype=jnp.float32)
    y2 = sigmoid_mlp(x2, params, block_rows=8)
    jax.block_until_ready(y2)
    assert y2.shape == (B2, 1)
    assert jnp.allclose(y2, reference(x2, params), atol=1e-5, rtol=1e-5)

    print("KERNEL_OK")
</pallas_src>

<mosaic_0001>
module attributes {stable_mosaic.version = 11 : i64} {
  func.func @_mlp_kernel(%arg0: i32, %arg1: memref<128xf32, #tpu.memory_space<smem>>, %arg2: memref<8x8x128xf32, #tpu.memory_space<vmem>>, %arg3: memref<8x128xf32, #tpu.memory_space<vmem>>) attributes {dimension_semantics = [#tpu.dimension_semantics<parallel>], iteration_bounds = array<i64: 1>, scalar_prefetch = 0 : i64, scratch_operands = 0 : i64, tpu.core_type = #tpu.core_type<tc>, window_params = [{transform_indices = @transform_0, window_bounds = array<i64: 128>}, {transform_indices = @transform_1, window_bounds = array<i64: 8, 8, 128>}, {transform_indices = @transform_2, window_bounds = array<i64: 8, 128>}]} {
    %c0 = arith.constant 0 : index
    %0 = memref.load %arg1[%c0] : memref<128xf32, #tpu.memory_space<smem>>
    %c1 = arith.constant 1 : index
    %1 = memref.load %arg1[%c1] : memref<128xf32, #tpu.memory_space<smem>>
    %c2 = arith.constant 2 : index
    %2 = memref.load %arg1[%c2] : memref<128xf32, #tpu.memory_space<smem>>
    %c3 = arith.constant 3 : index
    %3 = memref.load %arg1[%c3] : memref<128xf32, #tpu.memory_space<smem>>
    %c4 = arith.constant 4 : index
    %4 = memref.load %arg1[%c4] : memref<128xf32, #tpu.memory_space<smem>>
    %c5 = arith.constant 5 : index
    %5 = memref.load %arg1[%c5] : memref<128xf32, #tpu.memory_space<smem>>
    %c6 = arith.constant 6 : index
    %6 = memref.load %arg1[%c6] : memref<128xf32, #tpu.memory_space<smem>>
    %c7 = arith.constant 7 : index
    %7 = memref.load %arg1[%c7] : memref<128xf32, #tpu.memory_space<smem>>
    %c8 = arith.constant 8 : index
    %8 = memref.load %arg1[%c8] : memref<128xf32, #tpu.memory_space<smem>>
    %c9 = arith.constant 9 : index
    %9 = memref.load %arg1[%c9] : memref<128xf32, #tpu.memory_space<smem>>
    %c10 = arith.constant 10 : index
    %10 = memref.load %arg1[%c10] : memref<128xf32, #tpu.memory_space<smem>>
    %c11 = arith.constant 11 : index
    %11 = memref.load %arg1[%c11] : memref<128xf32, #tpu.memory_space<smem>>
    %c12 = arith.constant 12 : index
    %12 = memref.load %arg1[%c12] : memref<128xf32, #tpu.memory_space<smem>>
    %c13 = arith.constant 13 : index
    %13 = memref.load %arg1[%c13] : memref<128xf32, #tpu.memory_space<smem>>
    %c14 = arith.constant 14 : index
    %14 = memref.load %arg1[%c14] : memref<128xf32, #tpu.memory_space<smem>>
    %c15 = arith.constant 15 : index
    %15 = memref.load %arg1[%c15] : memref<128xf32, #tpu.memory_space<smem>>
    %c16 = arith.constant 16 : index
    %16 = memref.load %arg1[%c16] : memref<128xf32, #tpu.memory_space<smem>>
    %c17 = arith.constant 17 : index
    %17 = memref.load %arg1[%c17] : memref<128xf32, #tpu.memory_space<smem>>
    %c18 = arith.constant 18 : index
    %18 = memref.load %arg1[%c18] : memref<128xf32, #tpu.memory_space<smem>>
    %c19 = arith.constant 19 : index
    %19 = memref.load %arg1[%c19] : memref<128xf32, #tpu.memory_space<smem>>
    %c20 = arith.constant 20 : index
    %20 = memref.load %arg1[%c20] : memref<128xf32, #tpu.memory_space<smem>>
    %c21 = arith.constant 21 : index
    %21 = memref.load %arg1[%c21] : memref<128xf32, #tpu.memory_space<smem>>
    %c22 = arith.constant 22 : index
    %22 = memref.load %arg1[%c22] : memref<128xf32, #tpu.memory_space<smem>>
    %c23 = arith.constant 23 : index
    %23 = memref.load %arg1[%c23] : memref<128xf32, #tpu.memory_space<smem>>
    %c24 = arith.constant 24 : index
    %24 = memref.load %arg1[%c24] : memref<128xf32, #tpu.memory_space<smem>>
    %c25 = arith.constant 25 : index
    %25 = memref.load %arg1[%c25] : memref<128xf32, #tpu.memory_space<smem>>
    %c26 = arith.constant 26 : index
    %26 = memref.load %arg1[%c26] : memref<128xf32, #tpu.memory_space<smem>>
    %c27 = arith.constant 27 : index
    %27 = memref.load %arg1[%c27] : memref<128xf32, #tpu.memory_space<smem>>
    %c28 = arith.constant 28 : index
    %28 = memref.load %arg1[%c28] : memref<128xf32, #tpu.memory_space<smem>>
    %c29 = arith.constant 29 : index
    %29 = memref.load %arg1[%c29] : memref<128xf32, #tpu.memory_space<smem>>
    %c30 = arith.constant 30 : index
    %30 = memref.load %arg1[%c30] : memref<128xf32, #tpu.memory_space<smem>>
    %c31 = arith.constant 31 : index
    %31 = memref.load %arg1[%c31] : memref<128xf32, #tpu.memory_space<smem>>
    %c32 = arith.constant 32 : index
    %32 = memref.load %arg1[%c32] : memref<128xf32, #tpu.memory_space<smem>>
    %c33 = arith.constant 33 : index
    %33 = memref.load %arg1[%c33] : memref<128xf32, #tpu.memory_space<smem>>
    %c34 = arith.constant 34 : index
    %34 = memref.load %arg1[%c34] : memref<128xf32, #tpu.memory_space<smem>>
    %c35 = arith.constant 35 : index
    %35 = memref.load %arg1[%c35] : memref<128xf32, #tpu.memory_space<smem>>
    %c36 = arith.constant 36 : index
    %36 = memref.load %arg1[%c36] : memref<128xf32, #tpu.memory_space<smem>>
    %c37 = arith.constant 37 : index
    %37 = memref.load %arg1[%c37] : memref<128xf32, #tpu.memory_space<smem>>
    %c38 = arith.constant 38 : index
    %38 = memref.load %arg1[%c38] : memref<128xf32, #tpu.memory_space<smem>>
    %c39 = arith.constant 39 : index
    %39 = memref.load %arg1[%c39] : memref<128xf32, #tpu.memory_space<smem>>
    %c40 = arith.constant 40 : index
    %40 = memref.load %arg1[%c40] : memref<128xf32, #tpu.memory_space<smem>>
    %c41 = arith.constant 41 : index
    %41 = memref.load %arg1[%c41] : memref<128xf32, #tpu.memory_space<smem>>
    %c42 = arith.constant 42 : index
    %42 = memref.load %arg1[%c42] : memref<128xf32, #tpu.memory_space<smem>>
    %c43 = arith.constant 43 : index
    %43 = memref.load %arg1[%c43] : memref<128xf32, #tpu.memory_space<smem>>
    %c44 = arith.constant 44 : index
    %44 = memref.load %arg1[%c44] : memref<128xf32, #tpu.memory_space<smem>>
    %c45 = arith.constant 45 : index
    %45 = memref.load %arg1[%c45] : memref<128xf32, #tpu.memory_space<smem>>
    %c46 = arith.constant 46 : index
    %46 = memref.load %arg1[%c46] : memref<128xf32, #tpu.memory_space<smem>>
    %c47 = arith.constant 47 : index
    %47 = memref.load %arg1[%c47] : memref<128xf32, #tpu.memory_space<smem>>
    %c48 = arith.constant 48 : index
    %48 = memref.load %arg1[%c48] : memref<128xf32, #tpu.memory_space<smem>>
    %c49 = arith.constant 49 : index
    %49 = memref.load %arg1[%c49] : memref<128xf32, #tpu.memory_space<smem>>
    %c50 = arith.constant 50 : index
    %50 = memref.load %arg1[%c50] : memref<128xf32, #tpu.memory_space<smem>>
    %c51 = arith.constant 51 : index
    %51 = memref.load %arg1[%c51] : memref<128xf32, #tpu.memory_space<smem>>
    %c52 = arith.constant 52 : index
    %52 = memref.load %arg1[%c52] : memref<128xf32, #tpu.memory_space<smem>>
    %c53 = arith.constant 53 : index
    %53 = memref.load %arg1[%c53] : memref<128xf32, #tpu.memory_space<smem>>
    %c54 = arith.constant 54 : index
    %54 = memref.load %arg1[%c54] : memref<128xf32, #tpu.memory_space<smem>>
    %c55 = arith.constant 55 : index
    %55 = memref.load %arg1[%c55] : memref<128xf32, #tpu.memory_space<smem>>
    %c56 = arith.constant 56 : index
    %56 = memref.load %arg1[%c56] : memref<128xf32, #tpu.memory_space<smem>>
    %c57 = arith.constant 57 : index
    %57 = memref.load %arg1[%c57] : memref<128xf32, #tpu.memory_space<smem>>
    %c58 = arith.constant 58 : index
    %58 = memref.load %arg1[%c58] : memref<128xf32, #tpu.memory_space<smem>>
    %c59 = arith.constant 59 : index
    %59 = memref.load %arg1[%c59] : memref<128xf32, #tpu.memory_space<smem>>
    %c60 = arith.constant 60 : index
    %60 = memref.load %arg1[%c60] : memref<128xf32, #tpu.memory_space<smem>>
    %c61 = arith.constant 61 : index
    %61 = memref.load %arg1[%c61] : memref<128xf32, #tpu.memory_space<smem>>
    %c62 = arith.constant 62 : index
    %62 = memref.load %arg1[%c62] : memref<128xf32, #tpu.memory_space<smem>>
    %c63 = arith.constant 63 : index
    %63 = memref.load %arg1[%c63] : memref<128xf32, #tpu.memory_space<smem>>
    %c64 = arith.constant 64 : index
    %64 = memref.load %arg1[%c64] : memref<128xf32, #tpu.memory_space<smem>>
    %c65 = arith.constant 65 : index
    %65 = memref.load %arg1[%c65] : memref<128xf32, #tpu.memory_space<smem>>
    %c66 = arith.constant 66 : index
    %66 = memref.load %arg1[%c66] : memref<128xf32, #tpu.memory_space<smem>>
    %c67 = arith.constant 67 : index
    %67 = memref.load %arg1[%c67] : memref<128xf32, #tpu.memory_space<smem>>
    %c68 = arith.constant 68 : index
    %68 = memref.load %arg1[%c68] : memref<128xf32, #tpu.memory_space<smem>>
    %c69 = arith.constant 69 : index
    %69 = memref.load %arg1[%c69] : memref<128xf32, #tpu.memory_space<smem>>
    %c70 = arith.constant 70 : index
    %70 = memref.load %arg1[%c70] : memref<128xf32, #tpu.memory_space<smem>>
    %c71 = arith.constant 71 : index
    %71 = memref.load %arg1[%c71] : memref<128xf32, #tpu.memory_space<smem>>
    %c72 = arith.constant 72 : index
    %72 = memref.load %arg1[%c72] : memref<128xf32, #tpu.memory_space<smem>>
    %c73 = arith.constant 73 : index
    %73 = memref.load %arg1[%c73] : memref<128xf32, #tpu.memory_space<smem>>
    %c74 = arith.constant 74 : index
    %74 = memref.load %arg1[%c74] : memref<128xf32, #tpu.memory_space<smem>>
    %c75 = arith.constant 75 : index
    %75 = memref.load %arg1[%c75] : memref<128xf32, #tpu.memory_space<smem>>
    %c76 = arith.constant 76 : index
    %76 = memref.load %arg1[%c76] : memref<128xf32, #tpu.memory_space<smem>>
    %c77 = arith.constant 77 : index
    %77 = memref.load %arg1[%c77] : memref<128xf32, #tpu.memory_space<smem>>
    %c78 = arith.constant 78 : index
    %78 = memref.load %arg1[%c78] : memref<128xf32, #tpu.memory_space<smem>>
    %c79 = arith.constant 79 : index
    %79 = memref.load %arg1[%c79] : memref<128xf32, #tpu.memory_space<smem>>
    %c80 = arith.constant 80 : index
    %80 = memref.load %arg1[%c80] : memref<128xf32, #tpu.memory_space<smem>>
    %c81 = arith.constant 81 : index
    %81 = memref.load %arg1[%c81] : memref<128xf32, #tpu.memory_space<smem>>
    %c82 = arith.constant 82 : index
    %82 = memref.load %arg1[%c82] : memref<128xf32, #tpu.memory_space<smem>>
    %c83 = arith.constant 83 : index
    %83 = memref.load %arg1[%c83] : memref<128xf32, #tpu.memory_space<smem>>
    %c84 = arith.constant 84 : index
    %84 = memref.load %arg1[%c84] : memref<128xf32, #tpu.memory_space<smem>>
    %c85 = arith.constant 85 : index
    %85 = memref.load %arg1[%c85] : memref<128xf32, #tpu.memory_space<smem>>
    %c86 = arith.constant 86 : index
    %86 = memref.load %arg1[%c86] : memref<128xf32, #tpu.memory_space<smem>>
    %c0_i32 = arith.constant 0 : i32
    %c8_i32 = arith.constant 8 : i32
    %87 = arith.muli %c0_i32, %c8_i32 : i32
    %88 = tpu.assume_multiple %87, 8 : i32
    %c0_0 = arith.constant 0 : index
    %89 = arith.index_cast %88 : i32 to index
    %c0_1 = arith.constant 0 : index
    %90 = vector.load %arg2[%c0_0, %89, %c0_1] : memref<8x8x128xf32, #tpu.memory_space<vmem>>, vector<1x8x128xf32>
    %91 = vector.shape_cast %90 : vector<1x8x128xf32> to vector<8x128xf32>
    %c1_2 = arith.constant 1 : index
    %92 = arith.index_cast %88 : i32 to index
    %c0_3 = arith.constant 0 : index
    %93 = vector.load %arg2[%c1_2, %92, %c0_3] : memref<8x8x128xf32, #tpu.memory_space<vmem>>, vector<1x8x128xf32>
    %94 = vector.shape_cast %93 : vector<1x8x128xf32> to vector<8x128xf32>
    %c2_4 = arith.constant 2 : index
    %95 = arith.index_cast %88 : i32 to index
    %c0_5 = arith.constant 0 : index
    %96 = vector.load %arg2[%c2_4, %95, %c0_5] : memref<8x8x128xf32, #tpu.memory_space<vmem>>, vector<1x8x128xf32>
    %97 = vector.shape_cast %96 : vector<1x8x128xf32> to vector<8x128xf32>
    %c3_6 = arith.constant 3 : index
    %98 = arith.index_cast %88 : i32 to index
    %c0_7 = arith.constant 0 : index
    %99 = vector.load %arg2[%c3_6, %98, %c0_7] : memref<8x8x128xf32, #tpu.memory_space<vmem>>, vector<1x8x128xf32>
    %100 = vector.shape_cast %99 : vector<1x8x128xf32> to vector<8x128xf32>
    %c4_8 = arith.constant 4 : index
    %101 = arith.index_cast %88 : i32 to index
    %c0_9 = arith.constant 0 : index
    %102 = vector.load %arg2[%c4_8, %101, %c0_9] : memref<8x8x128xf32, #tpu.memory_space<vmem>>, vector<1x8x128xf32>
    %103 = vector.shape_cast %102 : vector<1x8x128xf32> to vector<8x128xf32>
    %c5_10 = arith.constant 5 : index
    %104 = arith.index_cast %88 : i32 to index
    %c0_11 = arith.constant 0 : index
    %105 = vector.load %arg2[%c5_10, %104, %c0_11] : memref<8x8x128xf32, #tpu.memory_space<vmem>>, vector<1x8x128xf32>
    %106 = vector.shape_cast %105 : vector<1x8x128xf32> to vector<8x128xf32>
    %c6_12 = arith.constant 6 : index
    %107 = arith.index_cast %88 : i32 to index
    %c0_13 = arith.constant 0 : index
    %108 = vector.load %arg2[%c6_12, %107, %c0_13] : memref<8x8x128xf32, #tpu.memory_space<vmem>>, vector<1x8x128xf32>
    %109 = vector.shape_cast %108 : vector<1x8x128xf32> to vector<8x128xf32>
    %c7_14 = arith.constant 7 : index
    %110 = arith.index_cast %88 : i32 to index
    %c0_15 = arith.constant 0 : index
    %111 = vector.load %arg2[%c7_14, %110, %c0_15] : memref<8x8x128xf32, #tpu.memory_space<vmem>>, vector<1x8x128xf32>
    %112 = vector.shape_cast %111 : vector<1x8x128xf32> to vector<8x128xf32>
    %113 = vector.broadcast %0 : f32 to vector<8x128xf32>
    %114 = arith.mulf %91, %113 : vector<8x128xf32>
    %115 = vector.broadcast %6 : f32 to vector<8x128xf32>
    %116 = arith.mulf %94, %115 : vector<8x128xf32>
    %117 = arith.addf %114, %116 : vector<8x128xf32>
    %118 = vector.broadcast %12 : f32 to vector<8x128xf32>
    %119 = arith.mulf %97, %118 : vector<8x128xf32>
    %120 = arith.addf %117, %119 : vector<8x128xf32>
    %121 = vector.broadcast %18 : f32 to vector<8x128xf32>
    %122 = arith.mulf %100, %121 : vector<8x128xf32>
    %123 = arith.addf %120, %122 : vector<8x128xf32>
    %124 = vector.broadcast %24 : f32 to vector<8x128xf32>
    %125 = arith.mulf %103, %124 : vector<8x128xf32>
    %126 = arith.addf %123, %125 : vector<8x128xf32>
    %127 = vector.broadcast %30 : f32 to vector<8x128xf32>
    %128 = arith.mulf %106, %127 : vector<8x128xf32>
    %129 = arith.addf %126, %128 : vector<8x128xf32>
    %130 = vector.broadcast %36 : f32 to vector<8x128xf32>
    %131 = arith.mulf %109, %130 : vector<8x128xf32>
    %132 = arith.addf %129, %131 : vector<8x128xf32>
    %133 = vector.broadcast %42 : f32 to vector<8x128xf32>
    %134 = arith.mulf %112, %133 : vector<8x128xf32>
    %135 = arith.addf %132, %134 : vector<8x128xf32>
    %136 = vector.broadcast %48 : f32 to vector<8x128xf32>
    %137 = arith.addf %135, %136 : vector<8x128xf32>
    %cst = arith.constant 0.000000e+00 : f32
    %138 = vector.broadcast %cst : f32 to vector<8x128xf32>
    %139 = arith.subf %138, %137 : vector<8x128xf32>
    %140 = math.exp %139 : vector<8x128xf32>
    %cst_16 = arith.constant 1.000000e+00 : f32
    %141 = vector.broadcast %cst_16 : f32 to vector<8x128xf32>
    %142 = arith.addf %141, %140 : vector<8x128xf32>
    %143 = tpu.reciprocal %142 : vector<8x128xf32> -> vector<8x128xf32>
    %144 = vector.broadcast %1 : f32 to vector<8x128xf32>
    %145 = arith.mulf %91, %144 : vector<8x128xf32>
    %146 = vector.broadcast %7 : f32 to vector<8x128xf32>
    %147 = arith.mulf %94, %146 : vector<8x128xf32>
    %148 = arith.addf %145, %147 : vector<8x128xf32>
    %149 = vector.broadcast %13 : f32 to vector<8x128xf32>
    %150 = arith.mulf %97, %149 : vector<8x128xf32>
    %151 = arith.addf %148, %150 : vector<8x128xf32>
    %152 = vector.broadcast %19 : f32 to vector<8x128xf32>
    %153 = arith.mulf %100, %152 : vector<8x128xf32>
    %154 = arith.addf %151, %153 : vector<8x128xf32>
    %155 = vector.broadcast %25 : f32 to vector<8x128xf32>
    %156 = arith.mulf %103, %155 : vector<8x128xf32>
    %157 = arith.addf %154, %156 : vector<8x128xf32>
    %158 = vector.broadcast %31 : f32 to vector<8x128xf32>
    %159 = arith.mulf %106, %158 : vector<8x128xf32>
    %160 = arith.addf %157, %159 : vector<8x128xf32>
    %161 = vector.broadcast %37 : f32 to vector<8x128xf32>
    %162 = arith.mulf %109, %161 : vector<8x128xf32>
    %163 = arith.addf %160, %162 : vector<8x128xf32>
    %164 = vector.broadcast %43 : f32 to vector<8x128xf32>
    %165 = arith.mulf %112, %164 : vector<8x128xf32>
    %166 = arith.addf %163, %165 : vector<8x128xf32>
    %167 = vector.broadcast %49 : f32 to vector<8x128xf32>
    %168 = arith.addf %166, %167 : vector<8x128xf32>
    %cst_17 = arith.constant 0.000000e+00 : f32
    %169 = vector.broadcast %cst_17 : f32 to vector<8x128xf32>
    %170 = arith.subf %169, %168 : vector<8x128xf32>
    %171 = math.exp %170 : vector<8x128xf32>
    %cst_18 = arith.constant 1.000000e+00 : f32
    %172 = vector.broadcast %cst_18 : f32 to vector<8x128xf32>
    %173 = arith.addf %172, %171 : vector<8x128xf32>
    %174 = tpu.reciprocal %173 : vector<8x128xf32> -> vector<8x128xf32>
    %175 = vector.broadcast %2 : f32 to vector<8x128xf32>
    %176 = arith.mulf %91, %175 : vector<8x128xf32>
    %177 = vector.broadcast %8 : f32 to vector<8x128xf32>
    %178 = arith.mulf %94, %177 : vector<8x128xf32>
    %179 = arith.addf %176, %178 : vector<8x128xf32>
    %180 = vector.broadcast %14 : f32 to vector<8x128xf32>
    %181 = arith.mulf %97, %180 : vector<8x128xf32>
    %182 = arith.addf %179, %181 : vector<8x128xf32>
    %183 = vector.broadcast %20 : f32 to vector<8x128xf32>
    %184 = arith.mulf %100, %183 : vector<8x128xf32>
    %185 = arith.addf %182, %184 : vector<8x128xf32>
    %186 = vector.broadcast %26 : f32 to vector<8x128xf32>
    %187 = arith.mulf %103, %186 : vector<8x128xf32>
    %188 = arith.addf %185, %187 : vector<8x128xf32>
    %189 = vector.broadcast %32 : f32 to vector<8x128xf32>
    %190 = arith.mulf %106, %189 : vector<8x128xf32>
    %191 = arith.addf %188, %190 : vector<8x128xf32>
    %192 = vector.broadcast %38 : f32 to vector<8x128xf32>
    %193 = arith.mulf %109, %192 : vector<8x128xf32>
    %194 = arith.addf %191, %193 : vector<8x128xf32>
    %195 = vector.broadcast %44 : f32 to vector<8x128xf32>
    %196 = arith.mulf %112, %195 : vector<8x128xf32>
    %197 = arith.addf %194, %196 : vector<8x128xf32>
    %198 = vector.broadcast %50 : f32 to vector<8x128xf32>
    %199 = arith.addf %197, %198 : vector<8x128xf32>
    %cst_19 = arith.constant 0.000000e+00 : f32
    %200 = vector.broadcast %cst_19 : f32 to vector<8x128xf32>
    %201 = arith.subf %200, %199 : vector<8x128xf32>
    %202 = math.exp %201 : vector<8x128xf32>
    %cst_20 = arith.constant 1.000000e+00 : f32
    %203 = vector.broadcast %cst_20 : f32 to vector<8x128xf32>
    %204 = arith.addf %203, %202 : vector<8x128xf32>
    %205 = tpu.reciprocal %204 : vector<8x128xf32> -> vector<8x128xf32>
    %206 = vector.broadcast %3 : f32 to vector<8x128xf32>
    %207 = arith.mulf %91, %206 : vector<8x128xf32>
    %208 = vector.broadcast %9 : f32 to vector<8x128xf32>
    %209 = arith.mulf %94, %208 : vector<8x128xf32>
    %210 = arith.addf %207, %209 : vector<8x128xf32>
    %211 = vector.broadcast %15 : f32 to vector<8x128xf32>
    %212 = arith.mulf %97, %211 : vector<8x128xf32>
    %213 = arith.addf %210, %212 : vector<8x128xf32>
    %214 = vector.broadcast %21 : f32 to vector<8x128xf32>
    %215 = arith.mulf %100, %214 : vector<8x128xf32>
    %216 = arith.addf %213, %215 : vector<8x128xf32>
    %217 = vector.broadcast %27 : f32 to vector<8x128xf32>
    %218 = arith.mulf %103, %217 : vector<8x128xf32>
    %219 = arith.addf %216, %218 : vector<8x128xf32>
    %220 = vector.broadcast %33 : f32 to vector<8x128xf32>
    %221 = arith.mulf %106, %220 : vector<8x128xf32>
    %222 = arith.addf %219, %221 : vector<8x128xf32>
    %223 = vector.broadcast %39 : f32 to vector<8x128xf32>
    %224 = arith.mulf %109, %223 : vector<8x128xf32>
    %225 = arith.addf %222, %224 : vector<8x128xf32>
    %226 = vector.broadcast %45 : f32 to vector<8x128xf32>
    %227 = arith.mulf %112, %226 : vector<8x128xf32>
    %228 = arith.addf %225, %227 : vector<8x128xf32>
    %229 = vector.broadcast %51 : f32 to vector<8x128xf32>
    %230 = arith.addf %228, %229 : vector<8x128xf32>
    %cst_21 = arith.constant 0.000000e+00 : f32
    %231 = vector.broadcast %cst_21 : f32 to vector<8x128xf32>
    %232 = arith.subf %231, %230 : vector<8x128xf32>
    %233 = math.exp %232 : vector<8x128xf32>
    %cst_22 = arith.constant 1.000000e+00 : f32
    %234 = vector.broadcast %cst_22 : f32 to vector<8x128xf32>
    %235 = arith.addf %234, %233 : vector<8x128xf32>
    %236 = tpu.reciprocal %235 : vector<8x128xf32> -> vector<8x128xf32>
    %237 = vector.broadcast %4 : f32 to vector<8x128xf32>
    %238 = arith.mulf %91, %237 : vector<8x128xf32>
    %239 = vector.broadcast %10 : f32 to vector<8x128xf32>
    %240 = arith.mulf %94, %239 : vector<8x128xf32>
    %241 = arith.addf %238, %240 : vector<8x128xf32>
    %242 = vector.broadcast %16 : f32 to vector<8x128xf32>
    %243 = arith.mulf %97, %242 : vector<8x128xf32>
    %244 = arith.addf %241, %243 : vector<8x128xf32>
    %245 = vector.broadcast %22 : f32 to vector<8x128xf32>
    %246 = arith.mulf %100, %245 : vector<8x128xf32>
    %247 = arith.addf %244, %246 : vector<8x128xf32>
    %248 = vector.broadcast %28 : f32 to vector<8x128xf32>
    %249 = arith.mulf %103, %248 : vector<8x128xf32>
    %250 = arith.addf %247, %249 : vector<8x128xf32>
    %251 = vector.broadcast %34 : f32 to vector<8x128xf32>
    %252 = arith.mulf %106, %251 : vector<8x128xf32>
    %253 = arith.addf %250, %252 : vector<8x128xf32>
    %254 = vector.broadcast %40 : f32 to vector<8x128xf32>
    %255 = arith.mulf %109, %254 : vector<8x128xf32>
    %256 = arith.addf %253, %255 : vector<8x128xf32>
    %257 = vector.broadcast %46 : f32 to vector<8x128xf32>
    %258 = arith.mulf %112, %257 : vector<8x128xf32>
    %259 = arith.addf %256, %258 : vector<8x128xf32>
    %260 = vector.broadcast %52 : f32 to vector<8x128xf32>
    %261 = arith.addf %259, %260 : vector<8x128xf32>
    %cst_23 = arith.constant 0.000000e+00 : f32
    %262 = vector.broadcast %cst_23 : f32 to vector<8x128xf32>
    %263 = arith.subf %262, %261 : vector<8x128xf32>
    %264 = math.exp %263 : vector<8x128xf32>
    %cst_24 = arith.constant 1.000000e+00 : f32
    %265 = vector.broadcast %cst_24 : f32 to vector<8x128xf32>
    %266 = arith.addf %265, %264 : vector<8x128xf32>
    %267 = tpu.reciprocal %266 : vector<8x128xf32> -> vector<8x128xf32>
    %268 = vector.broadcast %5 : f32 to vector<8x128xf32>
    %269 = arith.mulf %91, %268 : vector<8x128xf32>
    %270 = vector.broadcast %11 : f32 to vector<8x128xf32>
    %271 = arith.mulf %94, %270 : vector<8x128xf32>
    %272 = arith.addf %269, %271 : vector<8x128xf32>
    %273 = vector.broadcast %17 : f32 to vector<8x128xf32>
    %274 = arith.mulf %97, %273 : vector<8x128xf32>
    %275 = arith.addf %272, %274 : vector<8x128xf32>
    %276 = vector.broadcast %23 : f32 to vector<8x128xf32>
    %277 = arith.mulf %100, %276 : vector<8x128xf32>
    %278 = arith.addf %275, %277 : vector<8x128xf32>
    %279 = vector.broadcast %29 : f32 to vector<8x128xf32>
    %280 = arith.mulf %103, %279 : vector<8x128xf32>
    %281 = arith.addf %278, %280 : vector<8x128xf32>
    %282 = vector.broadcast %35 : f32 to vector<8x128xf32>
    %283 = arith.mulf %106, %282 : vector<8x128xf32>
    %284 = arith.addf %281, %283 : vector<8x128xf32>
    %285 = vector.broadcast %41 : f32 to vector<8x128xf32>
    %286 = arith.mulf %109, %285 : vector<8x128xf32>
    %287 = arith.addf %284, %286 : vector<8x128xf32>
    %288 = vector.broadcast %47 : f32 to vector<8x128xf32>
    %289 = arith.mulf %112, %288 : vector<8x128xf32>
    %290 = arith.addf %287, %289 : vector<8x128xf32>
    %291 = vector.broadcast %53 : f32 to vector<8x128xf32>
    %292 = arith.addf %290, %291 : vector<8x128xf32>
    %cst_25 = arith.constant 0.000000e+00 : f32
    %293 = vector.broadcast %cst_25 : f32 to vector<8x128xf32>
    %294 = arith.subf %293, %292 : vector<8x128xf32>
    %295 = math.exp %294 : vector<8x128xf32>
    %cst_26 = arith.constant 1.000000e+00 : f32
    %296 = vector.broadcast %cst_26 : f32 to vector<8x128xf32>
    %297 = arith.addf %296, %295 : vector<8x128xf32>
    %298 = tpu.reciprocal %297 : vector<8x128xf32> -> vector<8x128xf32>
    %299 = vector.broadcast %54 : f32 to vector<8x128xf32>
    %300 = arith.mulf %143, %299 : vector<8x128xf32>
    %301 = vector.broadcast %58 : f32 to vector<8x128xf32>
    %302 = arith.mulf %174, %301 : vector<8x128xf32>
    %303 = arith.addf %300, %302 : vector<8x128xf32>
    %304 = vector.broadcast %62 : f32 to vector<8x128xf32>
    %305 = arith.mulf %205, %304 : vector<8x128xf32>
    %306 = arith.addf %303, %305 : vector<8x128xf32>
    %307 = vector.broadcast %66 : f32 to vector<8x128xf32>
    %308 = arith.mulf %236, %307 : vector<8x128xf32>
    %309 = arith.addf %306, %308 : vector<8x128xf32>
    %310 = vector.broadcast %70 : f32 to vector<8x128xf32>
    %311 = arith.mulf %267, %310 : vector<8x128xf32>
    %312 = arith.addf %309, %311 : vector<8x128xf32>
    %313 = vector.broadcast %74 : f32 to vector<8x128xf32>
    %314 = arith.mulf %298, %313 : vector<8x128xf32>
    %315 = arith.addf %312, %314 : vector<8x128xf32>
    %316 = vector.broadcast %78 : f32 to vector<8x128xf32>
    %317 = arith.addf %315, %316 : vector<8x128xf32>
    %cst_27 = arith.constant 0.000000e+00 : f32
    %318 = vector.broadcast %cst_27 : f32 to vector<8x128xf32>
    %319 = arith.subf %318, %317 : vector<8x128xf32>
    %320 = math.exp %319 : vector<8x128xf32>
    %cst_28 = arith.constant 1.000000e+00 : f32
    %321 = vector.broadcast %cst_28 : f32 to vector<8x128xf32>
    %322 = arith.addf %321, %320 : vector<8x128xf32>
    %323 = tpu.reciprocal %322 : vector<8x128xf32> -> vector<8x128xf32>
    %324 = vector.broadcast %55 : f32 to vector<8x128xf32>
    %325 = arith.mulf %143, %324 : vector<8x128xf32>
    %326 = vector.broadcast %59 : f32 to vector<8x128xf32>
    %327 = arith.mulf %174, %326 : vector<8x128xf32>
    %328 = arith.addf %325, %327 : vector<8x128xf32>
    %329 = vector.broadcast %63 : f32 to vector<8x128xf32>
    %330 = arith.mulf %205, %329 : vector<8x128xf32>
    %331 = arith.addf %328, %330 : vector<8x128xf32>
    %332 = vector.broadcast %67 : f32 to vector<8x128xf32>
    %333 = arith.mulf %236, %332 : vector<8x128xf32>
    %334 = arith.addf %331, %333 : vector<8x128xf32>
    %335 = vector.broadcast %71 : f32 to vector<8x128xf32>
    %336 = arith.mulf %267, %335 : vector<8x128xf32>
    %337 = arith.addf %334, %336 : vector<8x128xf32>
    %338 = vector.broadcast %75 : f32 to vector<8x128xf32>
    %339 = arith.mulf %298, %338 : vector<8x128xf32>
    %340 = arith.addf %337, %339 : vector<8x128xf32>
    %341 = vector.broadcast %79 : f32 to vector<8x128xf32>
    %342 = arith.addf %340, %341 : vector<8x128xf32>
    %cst_29 = arith.constant 0.000000e+00 : f32
    %343 = vector.broadcast %cst_29 : f32 to vector<8x128xf32>
    %344 = arith.subf %343, %342 : vector<8x128xf32>
    %345 = math.exp %344 : vector<8x128xf32>
    %cst_30 = arith.constant 1.000000e+00 : f32
    %346 = vector.broadcast %cst_30 : f32 to vector<8x128xf32>
    %347 = arith.addf %346, %345 : vector<8x128xf32>
    %348 = tpu.reciprocal %347 : vector<8x128xf32> -> vector<8x128xf32>
    %349 = vector.broadcast %56 : f32 to vector<8x128xf32>
    %350 = arith.mulf %143, %349 : vector<8x128xf32>
    %351 = vector.broadcast %60 : f32 to vector<8x128xf32>
    %352 = arith.mulf %174, %351 : vector<8x128xf32>
    %353 = arith.addf %350, %352 : vector<8x128xf32>
    %354 = vector.broadcast %64 : f32 to vector<8x128xf32>
    %355 = arith.mulf %205, %354 : vector<8x128xf32>
    %356 = arith.addf %353, %355 : vector<8x128xf32>
    %357 = vector.broadcast %68 : f32 to vector<8x128xf32>
    %358 = arith.mulf %236, %357 : vector<8x128xf32>
    %359 = arith.addf %356, %358 : vector<8x128xf32>
    %360 = vector.broadcast %72 : f32 to vector<8x128xf32>
    %361 = arith.mulf %267, %360 : vector<8x128xf32>
    %362 = arith.addf %359, %361 : vector<8x128xf32>
    %363 = vector.broadcast %76 : f32 to vector<8x128xf32>
    %364 = arith.mulf %298, %363 : vector<8x128xf32>
    %365 = arith.addf %362, %364 : vector<8x128xf32>
    %366 = vector.broadcast %80 : f32 to vector<8x128xf32>
    %367 = arith.addf %365, %366 : vector<8x128xf32>
    %cst_31 = arith.constant 0.000000e+00 : f32
    %368 = vector.broadcast %cst_31 : f32 to vector<8x128xf32>
    %369 = arith.subf %368, %367 : vector<8x128xf32>
    %370 = math.exp %369 : vector<8x128xf32>
    %cst_32 = arith.constant 1.000000e+00 : f32
    %371 = vector.broadcast %cst_32 : f32 to vector<8x128xf32>
    %372 = arith.addf %371, %370 : vector<8x128xf32>
    %373 = tpu.reciprocal %372 : vector<8x128xf32> -> vector<8x128xf32>
    %374 = vector.broadcast %57 : f32 to vector<8x128xf32>
    %375 = arith.mulf %143, %374 : vector<8x128xf32>
    %376 = vector.broadcast %61 : f32 to vector<8x128xf32>
    %377 = arith.mulf %174, %376 : vector<8x128xf32>
    %378 = arith.addf %375, %377 : vector<8x128xf32>
    %379 = vector.broadcast %65 : f32 to vector<8x128xf32>
    %380 = arith.mulf %205, %379 : vector<8x128xf32>
    %381 = arith.addf %378, %380 : vector<8x128xf32>
    %382 = vector.broadcast %69 : f32 to vector<8x128xf32>
    %383 = arith.mulf %236, %382 : vector<8x128xf32>
    %384 = arith.addf %381, %383 : vector<8x128xf32>
    %385 = vector.broadcast %73 : f32 to vector<8x128xf32>
    %386 = arith.mulf %267, %385 : vector<8x128xf32>
    %387 = arith.addf %384, %386 : vector<8x128xf32>
    %388 = vector.broadcast %77 : f32 to vector<8x128xf32>
    %389 = arith.mulf %298, %388 : vector<8x128xf32>
    %390 = arith.addf %387, %389 : vector<8x128xf32>
    %391 = vector.broadcast %81 : f32 to vector<8x128xf32>
    %392 = arith.addf %390, %391 : vector<8x128xf32>
    %cst_33 = arith.constant 0.000000e+00 : f32
    %393 = vector.broadcast %cst_33 : f32 to vector<8x128xf32>
    %394 = arith.subf %393, %392 : vector<8x128xf32>
    %395 = math.exp %394 : vector<8x128xf32>
    %cst_34 = arith.constant 1.000000e+00 : f32
    %396 = vector.broadcast %cst_34 : f32 to vector<8x128xf32>
    %397 = arith.addf %396, %395 : vector<8x128xf32>
    %398 = tpu.reciprocal %397 : vector<8x128xf32> -> vector<8x128xf32>
    %399 = vector.broadcast %82 : f32 to vector<8x128xf32>
    %400 = arith.mulf %323, %399 : vector<8x128xf32>
    %401 = vector.broadcast %83 : f32 to vector<8x128xf32>
    %402 = arith.mulf %348, %401 : vector<8x128xf32>
    %403 = arith.addf %400, %402 : vector<8x128xf32>
    %404 = vector.broadcast %84 : f32 to vector<8x128xf32>
    %405 = arith.mulf %373, %404 : vector<8x128xf32>
    %406 = arith.addf %403, %405 : vector<8x128xf32>
    %407 = vector.broadcast %85 : f32 to vector<8x128xf32>
    %408 = arith.mulf %398, %407 : vector<8x128xf32>
    %409 = arith.addf %406, %408 : vector<8x128xf32>
    %410 = vector.broadcast %86 : f32 to vector<8x128xf32>
    %411 = arith.addf %409, %410 : vector<8x128xf32>
    %cst_35 = arith.constant 0.000000e+00 : f32
    %412 = vector.broadcast %cst_35 : f32 to vector<8x128xf32>
    %413 = arith.subf %412, %411 : vector<8x128xf32>
    %414 = math.exp %413 : vector<8x128xf32>
    %cst_36 = arith.constant 1.000000e+00 : f32
    %415 = vector.broadcast %cst_36 : f32 to vector<8x128xf32>
    %416 = arith.addf %415, %414 : vector<8x128xf32>
    %417 = tpu.reciprocal %416 : vector<8x128xf32> -> vector<8x128xf32>
    %418 = arith.index_cast %88 : i32 to index
    %c0_37 = arith.constant 0 : index
    %419 = vector.load %arg3[%418, %c0_37] : memref<8x128xf32, #tpu.memory_space<vmem>>, vector<8x128xf32>
    tpu.vector_store %arg3[%418, %c0_37], %417 {strides = array<i32>} : memref<8x128xf32, #tpu.memory_space<vmem>>, vector<8x128xf32>,
    %c1_i32 = arith.constant 1 : i32
    return
  }
  func.func @transform_0(%arg0: i32) -> i32 {
    %c0_i32 = arith.constant 0 : i32
    %c0_i32_0 = arith.constant 0 : i32
    return %c0_i32 : i32
  }
  func.func @transform_1(%arg0: i32) -> (i32, i32, i32) {
    %c0_i32 = arith.constant 0 : i32
    %c0_i32_0 = arith.constant 0 : i32
    %c0_i32_1 = arith.constant 0 : i32
    return %c0_i32, %arg0, %c0_i32_0 : i32, i32, i32
  }
  func.func @transform_2(%arg0: i32) -> (i32, i32) {
    %c0_i32 = arith.constant 0 : i32
    %c0_i32_0 = arith.constant 0 : i32
    return %arg0, %c0_i32 : i32, i32
  }
}

</mosaic_0001>

<bundles_post_ra>
// kernel: sigmoid_mlp.1
= control target key start
LH: loop header
LB: loop body
LE: loop exit
PB: predicated region body
PF: predicated region fallthrough
CT: control target
= control target key end

     0   :  { %7 = vsyncpa [#allocation3], 0  ;;  %s937_s0 = inlined_call_operand.vmem [shape: f32[128], index: 0, kind: input, shape index: {}]   ;;  %s938_s1 = inlined_call_operand.vmem [shape: f32[8,8,128], index: 1, kind: input, shape index: {}]   ;;  %s939_s2 = inlined_call_operand.vmem [shape: f32[8,128], index: 2, kind: output, shape index: {}]  }
   0x1   :  { %s14_s11 = sshll.u32 %s937_s0, 4  ;;  %s15_s11 = int_to_ptr.vmem [resolvable:$true] %s14_s11 }
   0x2   :  { %s578_s12 = scalar_lea.vmem %s15_s11, 16  ;;  %p583_p1 = scmp.lt.s32.totalorder %s15_s11, %s15_s11 }
   0x3   :  { %p579_p0 = scmp.ne.s32.totalorder %s15_s11, %s578_s12  ;;  %p584_p2 = scmp.lt.s32.totalorder %s578_s12, %s578_s12 }
   0x5   :  { %p585_p3 = por %p584_p2, %p583_p1 }
   0x7   :  { %p586_p4 = pnand %p585_p3, %p579_p0 }
   0x9   :  { %589 = shalt.err (!%p586_p4)
}
   0xa   :  { %s592_s13 = smov [#allocation2]  }
   0xb   :  { %17 = dma.vmem_to_smem %s15_s11, 16, %s592_s13, [#allocation3]  }
   0xc   :  { %590 = dma.done.wait [#allocation3], 16  }
   0xd   :  { %591 = vsyncadd [#allocation3], 4294967280 }
   0xe   :  { %23 = sfence }
   0xf   :  { %s24_s14 = sld [smem:[#allocation2]]  ;;  %s440_s15 = sld [smem:[#allocation2 + $0x1]]  ;;  %v622_v0 = vld [vmem:[%s938_s1] sm:$0xff]  ;;  %v639_v3 = vld [vmem:[%s938_s1 + $0x8] sm:$0xff]  ;;  %v659_v15 = vld [vmem:[%s938_s1 + $0x10] sm:$0xff] }
  0x10   :  { %s441_s16 = sld [smem:[#allocation2 + $0x2]]  ;;  %s442_s17 = sld [smem:[#allocation2 + $0x3]]  ;;  %v682_v28 = vld [vmem:[%s938_s1 + $0x18] sm:$0xff]  ;;  %v703_v41 = vld [vmem:[%s938_s1 + $0x20] sm:$0xff]  ;;  %v726_v54 = vld [vmem:[%s938_s1 + $0x28] sm:$0xff] }
  0x11   :  { %s443_s18 = sld [smem:[#allocation2 + $0x4]]  ;;  %s611_s19 = sld [smem:[#allocation2 + $0x5]] }
  0x12   :  { %s613_s0 = sld [smem:[#allocation2 + $0x6]]  ;;  %s446_s20 = sld [smem:[#allocation2 + $0x7]] }
  0x13   :  { %s615_s21 = sld [smem:[#allocation2 + $0x8]]  ;;  %s617_s22 = sld [smem:[#allocation2 + $0x9]] }
  0x14   :  { %s624_s25 = sld [smem:[#allocation2 + $0xa]]  ;;  %s626_s26 = sld [smem:[#allocation2 + $0xb]] }
  0x15   :  { %s628_s27 = sld [smem:[#allocation2 + $0xc]]  ;;  %s630_s28 = sld [smem:[#allocation2 + $0xd]]  ;;  %v133_v1 = vstv %s24_s14  ;;  %v163_v2 = vstv %s440_s15 }
  0x16   :  { %s632_s29 = sld [smem:[#allocation2 + $0xe]]  ;;  %s634_s30 = sld [smem:[#allocation2 + $0xf]]  ;;  %v134_v4 = vmul.f32 %v133_v1, %v622_v0  ;;  %v193_v5 = vstv %s441_s16  ;;  %v223_v6 = vstv %s442_s17  ;;  %v164_v7 = vmul.f32 %v163_v2, %v622_v0 }
  0x17   :  { %v194_v8 = vmul.f32 %v193_v5, %v622_v0  ;;  %v224_v9 = vmul.f32 %v223_v6, %v622_v0  ;;  %v253_v10 = vstv %s443_s18  ;;  %s645_s5 = sld [smem:[#allocation2 + $0x12]]  ;;  %s647_s6 = sld [smem:[#allocation2 + $0x13]]  ;;  %v283_v14 = vstv %s611_s19  ;;  %v747_v5 = vld [vmem:[%s938_s1 + $0x30] sm:$0xff] }
  0x18   :  { %v135_v11 = vstv %s613_s0  ;;  %v165_v12 = vstv %s446_s20  ;;  %v254_v13 = vmul.f32 %v253_v10, %v622_v0  ;;  %s652_s7 = sld [smem:[#allocation2 + $0x14]]  ;;  %s654_s8 = sld [smem:[#allocation2 + $0x15]] }
  0x19   :  { %v136_v16 = vmul.f32 %v639_v3, %v135_v11  ;;  %v166_v17 = vmul.f32 %v639_v3, %v165_v12  ;;  %v195_v18 = vstv %s615_s21  ;;  %v225_v19 = vstv %s617_s22  ;;  %s669_s11 = sld [smem:[#allocation2 + $0x18]]  ;;  %s671_s12 = sld [smem:[#allocation2 + $0x19]] }
  0x1a   :  { %v196_v20 = vmul.f32 %v639_v3, %v195_v18  ;;  %v226_v21 = vmul.f32 %v639_v3, %v225_v19  ;;  %v255_v22 = vstv %s624_s25  ;;  %v285_v23 = vstv %s626_s26  ;;  %s675_s13 = sld [smem:[#allocation2 + $0x1a]]  ;;  %s677_s14 = sld [smem:[#allocation2 + $0x1b]] }
  0x1b   :  { %v137_v24 = vadd.f32 %v136_v16, %v134_v4  ;;  %v138_v25 = vstv %s628_s27  ;;  %v167_v26 = vadd.f32 %v166_v17, %v164_v7  ;;  %v168_v27 = vstv %s630_s28  ;;  %s690_s17 = sld [smem:[#allocation2 + $0x1e]]  ;;  %s692_s18 = sld [smem:[#allocation2 + $0x1f]] }
  0x1c   :  { %v139_v29 = vmul.f32 %v659_v15, %v138_v25  ;;  %v169_v30 = vmul.f32 %v659_v15, %v168_v27  ;;  %v197_v31 = vadd.f32 %v196_v20, %v194_v8  ;;  %v198_v32 = vstv %s632_s29  ;;  %s696_s0 = sld [smem:[#allocation2 + $0x20]]  ;;  %s698_s20 = sld [smem:[#allocation2 + $0x21]]  ;;  %v772_v20 = vld [vmem:[%s938_s1 + $0x38] sm:$0xff] }
  0x1d   :  { %v199_v33 = vmul.f32 %v659_v15, %v198_v32  ;;  %v227_v34 = vadd.f32 %v226_v21, %v224_v9  ;;  %v228_v35 = vstv %s634_s30  ;;  %v256_v36 = vmul.f32 %v639_v3, %v255_v22  ;;  %s713_s23 = sld [smem:[#allocation2 + $0x24]]  ;;  %s715_s24 = sld [smem:[#allocation2 + $0x25]] }
  0x1e   :  { %v140_v37 = vadd.f32 %v139_v29, %v137_v24  ;;  %v141_v38 = vstv %s645_s5  ;;  %v170_v39 = vadd.f32 %v169_v30, %v167_v26  ;;  %v171_v40 = vstv %s647_s6  ;;  %s719_s25 = sld [smem:[#allocation2 + $0x26]]  ;;  %s721_s27 = sld [smem:[#allocation2 + $0x27]] }
  0x1f   :  { %v142_v42 = vmul.f32 %v682_v28, %v141_v38  ;;  %v172_v43 = vmul.f32 %v682_v28, %v171_v40  ;;  %v200_v44 = vadd.f32 %v199_v33, %v197_v31  ;;  %v201_v45 = vstv %s652_s7  ;;  %s734_s30 = sld [smem:[#allocation2 + $0x2a]]  ;;  %s736_s3 = sld [smem:[#allocation2 + $0x2b]] }
  0x20   :  { %v202_v46 = vmul.f32 %v682_v28, %v201_v45  ;;  %v229_v47 = vmul.f32 %v659_v15, %v228_v35  ;;  %v231_v48 = vstv %s654_s8  ;;  %v711_v49 = vadd.f32 %v256_v36, %v254_v13  ;;  %s740_s4 = sld [smem:[#allocation2 + $0x2c]]  ;;  %s742_s5 = sld [smem:[#allocation2 + $0x2d]] }
  0x21   :  { %v143_v50 = vadd.f32 %v142_v42, %v140_v37  ;;  %v144_v51 = vstv %s669_s11  ;;  %v173_v52 = vadd.f32 %v172_v43, %v170_v39  ;;  %v174_v53 = vstv %s671_s12  ;;  %s752_s8 = sld [smem:[#allocation2 + $0x10]]  ;;  %s754_s9 = sld [smem:[#allocation2 + $0x16]] }
  0x22   :  { %v145_v55 = vmul.f32 %v703_v41, %v144_v51  ;;  %v175_v56 = vmul.f32 %v703_v41, %v174_v53  ;;  %v203_v57 = vadd.f32 %v202_v46, %v200_v44  ;;  %v204_v58 = vstv %s675_s13  ;;  %s759_s10 = sld [smem:[#allocation2 + $0x30]]  ;;  %s761_s11 = sld [smem:[#allocation2 + $0x31]] }
  0x23   :  { %v205_v59 = vmul.f32 %v703_v41, %v204_v58  ;;  %v230_v60 = vadd.f32 %v229_v47, %v227_v34  ;;  %v232_v61 = vmul.f32 %v682_v28, %v231_v48  ;;  %v234_v62 = vstv %s677_s14  ;;  %s765_s12 = sld [smem:[#allocation2 + $0x32]]  ;;  %s767_s13 = sld [smem:[#allocation2 + $0x33]] }
  0x24   :  { %v146_v63 = vadd.f32 %v145_v55, %v143_v50  ;;  %v147_v1 = vstv %s690_s17  ;;  %v176_v2 = vadd.f32 %v175_v56, %v173_v52  ;;  %v177_v4 = vstv %s692_s18  ;;  %s777_s16 = sld [smem:[#allocation2 + $0x1c]]  ;;  %s782_s17 = sld [smem:[#allocation2 + $0x22]] }
  0x25   :  { %v148_v6 = vmul.f32 %v726_v54, %v147_v1  ;;  %v178_v7 = vmul.f32 %v726_v54, %v177_v4  ;;  %v206_v8 = vadd.f32 %v205_v59, %v203_v57  ;;  %v207_v9 = vstv %s696_s0  ;;  %s786_s1 = sld [smem:[#allocation2 + $0x28]]  ;;  %s788_s18 = sld [smem:[#allocation2 + $0x2e]] }
  0x26   :  { %v208_v10 = vmul.f32 %v726_v54, %v207_v9  ;;  %v233_v11 = vadd.f32 %v232_v61, %v230_v60  ;;  %v235_v12 = vmul.f32 %v703_v41, %v234_v62  ;;  %v237_v13 = vstv %s698_s20  ;;  %s798_s0 = sld [smem:[#allocation2 + $0x11]]  ;;  %s802_s20 = sld [smem:[#allocation2 + $0x17]] }
  0x27   :  { %v149_v16 = vadd.f32 %v148_v6, %v146_v63  ;;  %v150_v17 = vstv %s713_s23  ;;  %v179_v18 = vadd.f32 %v178_v7, %v176_v2  ;;  %v180_v19 = vstv %s715_s24  ;;  %s804_s21 = sld [smem:[#allocation2 + $0x1d]]  ;;  %s810_s22 = sld [smem:[#allocation2 + $0x23]] }
  0x28   :  { %v151_v21 = vmul.f32 %v747_v5, %v150_v17  ;;  %v181_v22 = vmul.f32 %v747_v5, %v180_v19  ;;  %v209_v24 = vadd.f32 %v208_v10, %v206_v8  ;;  %v210_v25 = vstv %s719_s25  ;;  %s816_s23 = sld [smem:[#allocation2 + $0x29]]  ;;  %s818_s24 = sld [smem:[#allocation2 + $0x34]] }
  0x29   :  { %v211_v26 = vmul.f32 %v747_v5, %v210_v25  ;;  %v236_v27 = vadd.f32 %v235_v12, %v233_v11  ;;  %v238_v29 = vmul.f32 %v726_v54, %v237_v13  ;;  %v240_v30 = vstv %s721_s27  ;;  %s827_s25 = sld [smem:[#allocation2 + $0x2f]]  ;;  %s841_s19 = sld [smem:[#allocation2 + $0x35]] }
  0x2a   :  { %v152_v31 = vadd.f32 %v151_v21, %v149_v16  ;;  %v153_v32 = vstv %s734_s30  ;;  %v182_v33 = vadd.f32 %v181_v22, %v179_v18  ;;  %v183_v34 = vstv %s736_s3  ;;  %s849_s26 = sld [smem:[#allocation2 + $0x36]]  ;;  %s851_s27 = sld [smem:[#allocation2 + $0x37]] }
  0x2b   :  { %v154_v35 = vmul.f32 %v772_v20, %v153_v32  ;;  %v184_v36 = vmul.f32 %v772_v20, %v183_v34  ;;  %v212_v37 = vadd.f32 %v211_v26, %v209_v24  ;;  %v213_v38 = vstv %s740_s4  ;;  %s854_s28 = sld [smem:[#allocation2 + $0x38]]  ;;  %s856_s29 = sld [smem:[#allocation2 + $0x3a]] }
  0x2c   :  { %v214_v39 = vmul.f32 %v772_v20, %v213_v38  ;;  %v239_v40 = vadd.f32 %v238_v29, %v236_v27  ;;  %v241_v42 = vmul.f32 %v747_v5, %v240_v30  ;;  %v243_v43 = vstv %s742_s5  ;;  %s858_s30 = sld [smem:[#allocation2 + $0x3b]]  ;;  %s860_s3 = sld [smem:[#allocation2 + $0x3c]] }
  0x2d   :  { %v155_v44 = vadd.f32 %v154_v35, %v152_v31  ;;  %v156_v45 = vstv %s759_s10  ;;  %v185_v46 = vadd.f32 %v184_v36, %v182_v33  ;;  %v186_v47 = vstv %s761_s11  ;;  %s862_s4 = sld [smem:[#allocation2 + $0x39]]  ;;  %s864_s5 = sld [smem:[#allocation2 + $0x3d]] }
  0x2e   :  { %v215_v48 = vadd.f32 %v214_v39, %v212_v37  ;;  %v216_v50 = vstv %s765_s12  ;;  %v242_v51 = vadd.f32 %v241_v42, %v239_v40  ;;  %v244_v52 = vmul.f32 %v772_v20, %v243_v43  ;;  %s866_s6 = sld [smem:[#allocation2 + $0x3e]]  ;;  %s868_s7 = sld [smem:[#allocation2 + $0x3f]] }
  0x2f   :  { %v157_v53 = vadd.f32 %v156_v45, %v155_v44  ;;  %v187_v55 = vadd.f32 %v186_v47, %v185_v46  ;;  %v246_v56 = vstv %s767_s13  ;;  %v258_v57 = vstv %s752_s8  ;;  %s870_s8 = sld [smem:[#allocation2 + $0x40]]  ;;  %s877_s10 = sld [smem:[#allocation2 + $0x42]] }
  0x30   :  { %v217_v58 = vadd.f32 %v216_v50, %v215_v48  ;;  %v245_v59 = vadd.f32 %v244_v52, %v242_v51  ;;  %v259_v60 = vmul.f32 %v659_v15, %v258_v57  ;;  %v261_v61 = vstv %s754_s9  ;;  %s872_s9 = sld [smem:[#allocation2 + $0x41]]  ;;  %s879_s11 = sld [smem:[#allocation2 + $0x43]] }
  0x31   :  { %v158_v62 = vsub.f32 0.0, %v157_v53  ;;  %v188_v63 = vsub.f32 0.0, %v187_v55  ;;  %v262_v1 = vmul.f32 %v682_v28, %v261_v61  ;;  %v264_v2 = vstv %s777_s16  ;;  %s884_s12 = sld [smem:[#allocation2 + $0x44]]  ;;  %s886_s13 = sld [smem:[#allocation2 + $0x45]] }
  0x32   :  { %v218_v4 = vsub.f32 0.0, %v217_v58  ;;  %v247_v6 = vadd.f32 %v246_v56, %v245_v59  ;;  %v260_v7 = vadd.f32 %v259_v60, %v711_v49  ;;  %v265_v8 = vmul.f32 %v703_v41, %v264_v2  ;;  %s893_s14 = sld [smem:[#allocation2 + $0x46]]  ;;  %s895_s15 = sld [smem:[#allocation2 + $0x47]] }
  0x33   :  { %v159_v9 = vmul.f32 1.442695, %v158_v62  ;;  %v267_v10 = vstv %s782_s17  ;;  %v270_v11 = vstv %s786_s1  ;;  %v273_v12 = vstv %s788_s18  ;;  %s898_s16 = sld [smem:[#allocation2 + $0x48]]  ;;  %s900_s17 = sld [smem:[#allocation2 + $0x49]] }
  0x34   :  { %v189_v13 = vmul.f32 1.442695, %v188_v63  ;;  %v263_v16 = vadd.f32 %v262_v1, %v260_v7  ;;  %v268_v17 = vmul.f32 %v726_v54, %v267_v10  ;;  %v284_v49 = vmul.f32 %v283_v14, %v622_v0  ;;  %s906_s1 = sld [smem:[#allocation2 + $0x4a]]  ;;  %s908_s18 = sld [smem:[#allocation2 + $0x4b]] }
  0x35   :  { %534 = vpow2.f32 %v159_v9  ;;  %v219_v18 = vmul.f32 1.442695, %v218_v4  ;;  %v271_v19 = vmul.f32 %v747_v5, %v270_v11  ;;  %v274_v21 = vmul.f32 %v772_v20, %v273_v12 }
  0x36   :  { %536 = vpow2.f32 %v189_v13  ;;  %v248_v22 = vsub.f32 0.0, %v247_v6  ;;  %v266_v24 = vadd.f32 %v265_v8, %v263_v16  ;;  %v286_v25 = vmul.f32 %v639_v3, %v285_v23 }
  0x37   :  { %538 = vpow2.f32 %v219_v18  ;;  %v288_v26 = vstv %s798_s0  ;;  %v291_v0 = vstv %s802_s20  ;;  %v294_v14 = vstv %s804_s21  ;;  %s910_s0 = sld [smem:[#allocation2 + $0x4c]]  ;;  %s912_s20 = sld [smem:[#allocation2 + $0x4d]] }
  0x38   :  { %v249_v27 = vmul.f32 1.442695, %v248_v22  ;;  %v269_v29 = vadd.f32 %v268_v17, %v266_v24  ;;  %v287_v30 = vadd.f32 %v286_v25, %v284_v49  ;;  %v289_v31 = vmul.f32 %v659_v15, %v288_v26  ;;  %s918_s21 = sld [smem:[#allocation2 + $0x4e]] }
  0x39   :  { %v292_v32 = vmul.f32 %v682_v28, %v291_v0  ;;  %v297_v33 = vstv %s810_s22  ;;  %v295_v3 = vmul.f32 %v703_v41, %v294_v14  ;;  %v276_v23 = vstv %s818_s24  ;;  %s920_s22 = sld [smem:[#allocation2 + $0x4f]]  ;;  %s924_s24 = sld [smem:[#allocation2 + $0x51]] }
  0x3a   :  { %540 = vpow2.f32 %v249_v27  ;;  %v272_v34 = vadd.f32 %v271_v19, %v269_v29  ;;  %v290_v35 = vadd.f32 %v289_v31, %v287_v30  ;;  %v300_v36 = vstv %s816_s23  ;;  %s922_s23 = sld [smem:[#allocation2 + $0x50]] }
  0x3b   :  { %v298_v39 = vmul.f32 %v726_v54, %v297_v33  ;;  %v303_v40 = vstv %s827_s25  ;;  %v301_v15 = vmul.f32 %v747_v5, %v300_v36  ;;  %v306_v54 = vstv %s841_s19  ;;  %s521_s25 = sld [smem:[#allocation2 + $0x52]]  ;;  %s522_s19 = sld [smem:[#allocation2 + $0x53]] }
  0x3c   :  { %v275_v37 = vadd.f32 %v274_v21, %v272_v34  ;;  %v293_v38 = vadd.f32 %v292_v32, %v290_v35  ;;  %v304_v41 = vmul.f32 %v772_v20, %v303_v40  ;;  %v313_v60 = vstv %s849_s26  ;;  %s523_s26 = sld [smem:[#allocation2 + $0x54]] }
  0x3d   :  { %v315_v61 = vstv %s856_s29  ;;  %v337_v62 = vstv %s851_s27  ;;  %v339_v1 = vstv %s858_s30  ;;  %v361_v2 = vstv %s854_s28  ;;  %s524_s27 = sld [smem:[#allocation2 + $0x55]]  ;;  %s525_s28 = sld [smem:[#allocation2 + $0x56]] }
  0x3e   :  { %v277_v42 = vadd.f32 %v276_v23, %v275_v37  ;;  %v296_v43 = vadd.f32 %v295_v3, %v293_v38  ;;  %v363_v4 = vstv %s860_s3  ;;  %v385_v6 = vstv %s862_s4 }
  0x3f   :  { %v535_v28 = vpop.eup %534  ;;  %v387_v7 = vstv %s864_s5  ;;  %v318_v11 = vstv %s866_s6  ;;  %v342_v19 = vstv %s868_s7  ;;  %v366_v21 = vstv %s870_s8 }
  0x40   :  { %v537_v44 = vpop.eup %536  ;;  %v161_v45 = vadd.f32 1.0, %v535_v28  ;;  %v278_v46 = vsub.f32 0.0, %v277_v42  ;;  %v299_v47 = vadd.f32 %v298_v39, %v296_v43  ;;  %v390_v25 = vstv %s872_s9 }
  0x41   :  { %v539_v48 = vpop.eup %538  ;;  %v191_v50 = vadd.f32 1.0, %v537_v44  ;;  %v321_v32 = vstv %s877_s10  ;;  %v345_v33 = vstv %s879_s11  ;;  %v369_v23 = vstv %s884_s12 }
  0x42   :  { %542 = vrcp.f32 %v161_v45  ;;  %v221_v51 = vadd.f32 1.0, %v539_v48  ;;  %v279_v52 = vmul.f32 1.442695, %v278_v46  ;;  %v302_v53 = vadd.f32 %v301_v15, %v299_v47 }
  0x43   :  { %544 = vrcp.f32 %v191_v50  ;;  %v393_v36 = vstv %s886_s13  ;;  %v324_v45 = vstv %s893_s14  ;;  %v348_v46 = vstv %s895_s15 }
  0x44   :  { %v541_v5 = vpop.eup %540  ;;  %v305_v55 = vadd.f32 %v304_v41, %v302_v53  ;;  %546 = vpow2.f32 %v279_v52  ;;  %v372_v47 = vstv %s898_s16  ;;  %v396_v41 = vstv %s900_s17 }
  0x45   :  { %548 = vrcp.f32 %v221_v51  ;;  %v251_v56 = vadd.f32 1.0, %v541_v5 }
  0x46   :  { %v307_v20 = vadd.f32 %v306_v54, %v305_v55 }
  0x47   :  { %550 = vrcp.f32 %v251_v56  ;;  %v327_v56 = vstv %s906_s1 }
  0x48   :  { %v308_v57 = vsub.f32 0.0, %v307_v20 }
  0x4a   :  { %v309_v58 = vmul.f32 1.442695, %v308_v57  ;;  %v351_v57 = vstv %s908_s18 }
  0x4c   :  { %v543_v59 = vpop.eup %542  ;;  %552 = vpow2.f32 %v309_v58  ;;  %v375_v58 = vstv %s910_s0 }
  0x4d   :  { %v545_v63 = vpop.eup %544  ;;  %v314_v9 = vmul.f32 %v543_v59, %v313_v60  ;;  %v338_v12 = vmul.f32 %v543_v59, %v337_v62  ;;  %v362_v49 = vmul.f32 %v543_v59, %v361_v2  ;;  %v386_v22 = vmul.f32 %v543_v59, %v385_v6 }
  0x4e   :  { %v547_v8 = vpop.eup %546  ;;  %v316_v10 = vmul.f32 %v545_v63, %v315_v61  ;;  %v340_v17 = vmul.f32 %v545_v63, %v339_v1  ;;  %v364_v18 = vmul.f32 %v545_v63, %v363_v4  ;;  %v388_v24 = vmul.f32 %v545_v63, %v387_v7 }
  0x4f   :  { %v549_v13 = vpop.eup %548  ;;  %v281_v16 = vadd.f32 1.0, %v547_v8  ;;  %v399_v59 = vstv %s912_s20  ;;  %v330_v8 = vstv %s918_s21 }
  0x50   :  { %v317_v26 = vadd.f32 %v316_v10, %v314_v9  ;;  %v319_v0 = vmul.f32 %v549_v13, %v318_v11  ;;  %v341_v14 = vadd.f32 %v340_v17, %v338_v12  ;;  %v343_v27 = vmul.f32 %v549_v13, %v342_v19 }
  0x51   :  { %554 = vrcp.f32 %v281_v16  ;;  %v365_v29 = vadd.f32 %v364_v18, %v362_v49  ;;  %v367_v30 = vmul.f32 %v549_v13, %v366_v21  ;;  %v551_v31 = vpop.eup %550  ;;  %v389_v34 = vadd.f32 %v388_v24, %v386_v22 }
  0x52   :  { %v391_v35 = vmul.f32 %v549_v13, %v390_v25  ;;  %v320_v38 = vadd.f32 %v319_v0, %v317_v26  ;;  %v322_v39 = vmul.f32 %v551_v31, %v321_v32  ;;  %v344_v40 = vadd.f32 %v343_v27, %v341_v14 }
  0x53   :  { %v346_v42 = vmul.f32 %v551_v31, %v345_v33  ;;  %v368_v43 = vadd.f32 %v367_v30, %v365_v29  ;;  %v370_v15 = vmul.f32 %v551_v31, %v369_v23  ;;  %v394_v44 = vmul.f32 %v551_v31, %v393_v36 }
  0x54   :  { %v392_v28 = vadd.f32 %v391_v35, %v389_v34  ;;  %v323_v50 = vadd.f32 %v322_v39, %v320_v38  ;;  %v354_v9 = vstv %s920_s22  ;;  %v378_v10 = vstv %s922_s23 }
  0x55   :  { %v347_v51 = vadd.f32 %v346_v42, %v344_v40  ;;  %v371_v52 = vadd.f32 %v370_v15, %v368_v43  ;;  %v402_v11 = vstv %s924_s24  ;;  %v409_v36 = vstv %s521_s25 }
  0x56   :  { %v553_v3 = vpop.eup %552  ;;  %v395_v53 = vadd.f32 %v394_v44, %v392_v28  ;;  %v414_v39 = vstv %s523_s26  ;;  %v417_v43 = vstv %s524_s27 }
  0x57   :  { %v311_v37 = vadd.f32 1.0, %v553_v3 }
  0x59   :  { %556 = vrcp.f32 %v311_v37  ;;  %v411_v37 = vstv %s522_s19 }
  0x5b   :  { %v555_v48 = vpop.eup %554 }
  0x5c   :  { %v325_v54 = vmul.f32 %v555_v48, %v324_v45  ;;  %v349_v5 = vmul.f32 %v555_v48, %v348_v46  ;;  %v373_v55 = vmul.f32 %v555_v48, %v372_v47  ;;  %v397_v20 = vmul.f32 %v555_v48, %v396_v41 }
  0x5d   :  { %v420_v48 = vstv %s525_s28 }
  0x5e   :  { %v326_v60 = vadd.f32 %v325_v54, %v323_v50  ;;  %v350_v61 = vadd.f32 %v349_v5, %v347_v51  ;;  %v374_v62 = vadd.f32 %v373_v55, %v371_v52  ;;  %v398_v63 = vadd.f32 %v397_v20, %v395_v53 }
  0x63   :  { %v557_v1 = vpop.eup %556 }
  0x64   :  { %v328_v2 = vmul.f32 %v557_v1, %v327_v56  ;;  %v352_v4 = vmul.f32 %v557_v1, %v351_v57  ;;  %v376_v6 = vmul.f32 %v557_v1, %v375_v58  ;;  %v400_v7 = vmul.f32 %v557_v1, %v399_v59 }
  0x66   :  { %v329_v12 = vadd.f32 %v328_v2, %v326_v60  ;;  %v353_v13 = vadd.f32 %v352_v4, %v350_v61  ;;  %v377_v16 = vadd.f32 %v376_v6, %v374_v62  ;;  %v401_v17 = vadd.f32 %v400_v7, %v398_v63 }
  0x68   :  { %v331_v49 = vadd.f32 %v330_v8, %v329_v12  ;;  %v355_v18 = vadd.f32 %v354_v9, %v353_v13  ;;  %v379_v19 = vadd.f32 %v378_v10, %v377_v16  ;;  %v403_v21 = vadd.f32 %v402_v11, %v401_v17 }
  0x6a   :  { %v332_v22 = vsub.f32 0.0, %v331_v49  ;;  %v356_v24 = vsub.f32 0.0, %v355_v18  ;;  %v380_v25 = vsub.f32 0.0, %v379_v19  ;;  %v404_v26 = vsub.f32 0.0, %v403_v21 }
  0x6c   :  { %v333_v0 = vmul.f32 1.442695, %v332_v22  ;;  %v357_v14 = vmul.f32 1.442695, %v356_v24  ;;  %v381_v27 = vmul.f32 1.442695, %v380_v25 }
  0x6d   :  { %v405_v29 = vmul.f32 1.442695, %v404_v26 }
  0x6e   :  { %558 = vpow2.f32 %v333_v0 }
  0x6f   :  { %560 = vpow2.f32 %v357_v14 }
  0x70   :  { %562 = vpow2.f32 %v381_v27 }
  0x71   :  { %564 = vpow2.f32 %v405_v29 }
  0x78   :  { %v559_v30 = vpop.eup %558 }
  0x79   :  { %v561_v31 = vpop.eup %560  ;;  %v335_v32 = vadd.f32 1.0, %v559_v30 }
  0x7a   :  { %v563_v33 = vpop.eup %562  ;;  %v359_v34 = vadd.f32 1.0, %v561_v31 }
  0x7b   :  { %v565_v35 = vpop.eup %564  ;;  %566 = vrcp.f32 %v335_v32  ;;  %v383_v3 = vadd.f32 1.0, %v563_v33 }
  0x7c   :  { %568 = vrcp.f32 %v359_v34  ;;  %v407_v23 = vadd.f32 1.0, %v565_v35 }
  0x7d   :  { %570 = vrcp.f32 %v383_v3 }
  0x7e   :  { %572 = vrcp.f32 %v407_v23 }
  0x85   :  { %v567_v38 = vpop.eup %566 }
  0x86   :  { %v569_v40 = vpop.eup %568  ;;  %v410_v42 = vmul.f32 %v567_v38, %v409_v36 }
  0x87   :  { %v571_v15 = vpop.eup %570  ;;  %v412_v28 = vmul.f32 %v569_v40, %v411_v37 }
  0x88   :  { %v573_v44 = vpop.eup %572  ;;  %v415_v45 = vmul.f32 %v571_v15, %v414_v39 }
  0x89   :  { %v413_v46 = vadd.f32 %v412_v28, %v410_v42  ;;  %v418_v47 = vmul.f32 %v573_v44, %v417_v43 }
  0x8b   :  { %v416_v41 = vadd.f32 %v415_v45, %v413_v46 }
  0x8d   :  { %v419_v50 = vadd.f32 %v418_v47, %v416_v41 }
  0x8f   :  { %v421_v51 = vadd.f32 %v420_v48, %v419_v50 }
  0x91   :  { %v422_v52 = vsub.f32 0.0, %v421_v51 }
  0x93   :  { %v423_v53 = vmul.f32 1.442695, %v422_v52 }
  0x95   :  { %574 = vpow2.f32 %v423_v53 }
  0x9f   :  { %v575_v54 = vpop.eup %574 }
  0xa0   :  { %v425_v5 = vadd.f32 1.0, %v575_v54 }
  0xa2   :  { %576 = vrcp.f32 %v425_v5 }
  0xac   :  { %v577_v55 = vpop.eup %576 }
  0xad   :  { %427 = vst [vmem:[%s939_s2] sm:$0xff] %v577_v55 }
  0xae   :  { %432 = vsyncpa [#allocation3], 1 }

</bundles_post_ra>
